<compile_context>
chip_gen: v6e
topology: v6e:2x2x1
jax: 0.10.0
libtpu: 0.0.40
codegen_flags: <defaults>
</compile_context>

<pallas_src>
import functools

import jax
import jax.numpy as jnp
from jax.experimental import pallas as pl
from jax.experimental.pallas import tpu as pltpu


def _round_up(x, m):
    return ((x + m - 1) // m) * m


def _vmem_capacity_bytes():
    try:
        cap = getattr(pltpu.get_tpu_info(), "vmem_capacity_bytes", None)
        if cap:
            return int(cap)
    except Exception:
        pass
    return 128 << 20  # v5e/v6e default


def _choose_tiles(B, D, itemsize):
    """Tiles obeying the (8,128) rule, generation-aware VMEM budget, and >= 2
    batch tiles when B > 16 (so v7x's two TensorCores both get work)."""
    vmem_cap = _vmem_capacity_bytes()
    # Budget for 2 inputs x 2 pipeline buffers x (TB, TD):
    #   v7x: 64 MiB VMEM/TC, batch split across 2 cores  -> ~12 MiB
    #   v5e/v6e: 128 MiB VMEM, 1 TC -> bigger tiles, fewer grid steps
    io_budget = (12 << 20) if vmem_cap <= (64 << 20) else (24 << 20)

    # Batch (sublane) tile: multiple of 8; force >= 2 batch tiles when B > 16.
    if B <= 16:
        TB = B
    else:
        TB = min(256, _round_up(pl.cdiv(B, 2), 8))

    # Feature (lane) tile: as large as the budget allows, multiple of 128.
    td_cap = io_budget // (2 * 2 * TB * itemsize)
    td_cap = max(128, min(16384, (td_cap // 128) * 128))
    if D <= td_cap:
        TD = D          # full feature dim: always legal, never needs a mask
    else:
        TD = td_cap     # ragged tail masked only on the final D tile
        # Prefer a TD that divides D exactly (no mask at all) if it is not
        # much smaller than the cap.
        for cand in range(td_cap, max(127, td_cap // 2 - 1), -128):
            if D % cand == 0:
                TD = cand
                break
    return TB, TD


def _lane_group_sum(x, lanes):
    """(TB, TD) -> (TB, lanes) using only lane-aligned static slices + VPU adds
    (no per-step cross-lane XLU reduce, no layout-changing reshape)."""
    td = x.shape[1]
    acc = x[:, 0:lanes]
    for off in range(lanes, td, lanes):
        acc = acc + x[:, off:off + lanes]
    return acc


def _sumsq_kernel(yp_ref, yt_ref, out_ref, acc_ref, *, d_true, td, lanes, needs_mask):
    """Accumulate per-sample sum of squared differences over the D grid axis."""
    k = pl.program_id(1)
    nk = pl.num_programs(1)

    @pl.when(k == 0)
    def _():
        acc_ref[...] = jnp.zeros_like(acc_ref)

    # Subtract in the native input dtype (packed bf16 VALU sub on v6e/v7x),
    # cast only the diff to f32 before squaring/accumulating.
    diff = (yp_ref[...] - yt_ref[...]).astype(jnp.float32)
    sq = diff * diff

    if needs_mask:
        # Ragged D tail: iota/compare/select only on the last feature tile.
        @pl.when(k != nk - 1)
        def _():
            acc_ref[...] += _lane_group_sum(sq, lanes)

        @pl.when(k == nk - 1)
        def _():
            col = jax.lax.broadcasted_iota(jnp.int32, sq.shape, 1) + k * td
            acc_ref[...] += _lane_group_sum(jnp.where(col < d_true, sq, 0.0), lanes)
    else:
        acc_ref[...] += _lane_group_sum(sq, lanes)

    # One cross-lane reduce + one (TB, 1) store per batch tile.
    @pl.when(k == nk - 1)
    def _():
        out_ref[...] = jnp.sum(acc_ref[...], axis=1, keepdims=True)


def _finalize_kernel(loss_ref, out_ref, *, inv_d, batch, reduction):
    """min/max + final reduction over the lane-dense (1, B) loss row (tiny)."""
    loss = loss_ref[...] * inv_d              # per-sample MSE, shape (1, B)
    mn = jnp.min(loss)
    mx = jnp.max(loss)
    denom = mx - mn                           # NaN when all losses equal (matches torch)
    if reduction == "mean":
        # mean(norm) == (mean(loss) - min) / (max - min): norm never materialized.
        out_ref[...] = ((jnp.mean(loss) - mn) / denom).reshape(1, 1)
    elif reduction == "sum":
        # sum(norm) == (sum(loss) - B*min) / (max - min)
        out_ref[...] = ((jnp.sum(loss) - batch * mn) / denom).reshape(1, 1)
    else:  # 'none' -> per-sample normalized loss, lane-dense (1, B)
        out_ref[...] = (loss - mn) / denom


def mse_loss_norm(y_pred, y_true, reduction="mean", *, _tile_override=None):
    """Pallas implementation of MSELossNorm.forward for (B, D) inputs."""
    assert y_pred.shape == y_true.shape, (y_pred.shape, y_true.shape)
    assert y_pred.ndim == 2, "MSELossNorm expects (batch, features) inputs"
    B, D = y_pred.shape
    itemsize = max(jnp.dtype(y_pred.dtype).itemsize, jnp.dtype(y_true.dtype).itemsize)

    if _tile_override is not None:
        TB, TD = _tile_override            # testing hook for small forced tilings
    else:
        TB, TD = _choose_tiles(B, D, itemsize)
    lanes = 128 if TD % 128 == 0 else TD   # TD not a multiple of 128 => TD == D (one tile)
    needs_mask = (D % TD) != 0
    grid = (pl.cdiv(B, TB), pl.cdiv(D, TD))

    vmem_limit = int(
        2 * 2 * TB * TD * itemsize         # double-buffered input tiles
        + TB * max(lanes, 128) * 4         # f32 scratch accumulator
        + 2 * TB * 128 * 4                 # (TB, 1) out block (lane-padded), 2 buffers
        + (8 << 20)                        # headroom
    )
    vmem_limit = min(vmem_limit, (_vmem_capacity_bytes() * 3) // 4)

    # ---- Stage 1: per-sample sum of squared differences (HBM-bound) --------
    sumsq = pl.pallas_call(
        functools.partial(_sumsq_kernel, d_true=D, td=TD, lanes=lanes,
                          needs_mask=needs_mask),
        out_shape=jax.ShapeDtypeStruct((B, 1), jnp.float32),
        grid_spec=pltpu.PrefetchScalarGridSpec(
            num_scalar_prefetch=0,
            grid=grid,
            in_specs=[
                pl.BlockSpec((TB, TD), lambda i, k: (i, k)),
                pl.BlockSpec((TB, TD), lambda i, k: (i, k)),
            ],
            out_specs=pl.BlockSpec((TB, 1), lambda i, k: (i, 0)),
            scratch_shapes=[pltpu.VMEM((TB, lanes), jnp.float32)],
        ),
        compiler_params=pltpu.CompilerParams(
            dimension_semantics=("parallel", "arbitrary"),
            vmem_limit_bytes=vmem_limit,
        ),
        cost_estimate=pl.CostEstimate(
            flops=3 * B * D,
            transcendentals=0,
            bytes_accessed=B * D * (jnp.dtype(y_pred.dtype).itemsize
                                    + jnp.dtype(y_true.dtype).itemsize) + B * 4,
        ),
    )(y_pred, y_true)

    # Lane-dense inter-stage layout: a (B, 1) block lane-pads to B*512 bytes of
    # VMEM in stage 2; (1, B) is 128x smaller and stores full vector widths.
    loss_row = sumsq.reshape(1, B)

    # ---- Stage 2: tiny finalization over B floats ---------------------------
    out_shape = (1, 1) if reduction in ("mean", "sum") else (1, B)
    out = pl.pallas_call(
        functools.partial(_finalize_kernel, inv_d=1.0 / D, batch=float(B),
                          reduction=reduction),
        out_shape=jax.ShapeDtypeStruct(out_shape, jnp.float32),
    )(loss_row)

    if reduction in ("mean", "sum"):
        return out[0, 0]
    return out[0, :]


if __name__ == "__main__":
    key = jax.random.PRNGKey(0)

    def reference(yp, yt, reduction):
        loss = jnp.mean((yp.astype(jnp.float32) - yt.astype(jnp.float32)) ** 2, axis=1)
        norm = (loss - jnp.min(loss)) / (jnp.max(loss) - jnp.min(loss))
        if reduction == "mean":
            return jnp.mean(norm)
        if reduction == "sum":
            return jnp.sum(norm)
        return norm

    # Small, module-consistent shapes: batch=8, hidden=32 (single tile).
    k1, k2 = jax.random.split(key)
    yp = jax.random.normal(k1, (8, 32), dtype=jnp.float32)
    yt = jax.random.normal(k2, (8, 32), dtype=jnp.float32)
    for reduction in ("mean", "sum", "none"):
        got = jax.block_until_ready(mse_loss_norm(yp, yt, reduction))
        ref = reference(yp, yt, reduction)
        assert jnp.allclose(got, ref, atol=1e-6, rtol=1e-5), (reduction, got, ref)

    # Lane-group accumulation path: D=1536 -> full-dim tile, 12 lane-group VPU
    # adds per step, one cross-lane reduce per batch tile.
    k3, k4 = jax.random.split(k1)
    yp2 = jax.random.normal(k3, (16, 1536), dtype=jnp.float32)
    yt2 = jax.random.normal(k4, (16, 1536), dtype=jnp.float32)
    got2 = jax.block_until_ready(mse_loss_norm(yp2, yt2, "mean"))
    ref2 = reference(yp2, yt2, "mean")
    assert jnp.allclose(got2, ref2, atol=1e-4, rtol=1e-3), (got2, ref2)

    # Forced small tiles: 2 batch tiles (padded rows on the last one), ragged D
    # tail masked only on the final feature tile, bf16 subtract-then-cast path.
    k5, k6 = jax.random.split(k2)
    yp3 = jax.random.normal(k5, (40, 200), dtype=jnp.bfloat16)
    yt3 = jax.random.normal(k6, (40, 200), dtype=jnp.bfloat16)
    got3 = jax.block_until_ready(
        mse_loss_norm(yp3, yt3, "none", _tile_override=(32, 128)))
    ref3 = reference(yp3, yt3, "none")
    assert jnp.allclose(got3, ref3, atol=5e-2, rtol=5e-2), (got3, ref3)

    print("KERNEL_OK")
</pallas_src>

<mosaic_0001>
module attributes {stable_mosaic.version = 11 : i64} {
  func.func @_sumsq_kernel(%arg0: i32, %arg1: i32, %arg2: memref<8x32xf32, #tpu.memory_space<vmem>>, %arg3: memref<8x32xf32, #tpu.memory_space<vmem>>, %arg4: memref<8x1xf32, #tpu.memory_space<vmem>>, %arg5: memref<8x32xf32, #tpu.memory_space<vmem>>) attributes {dimension_semantics = [#tpu.dimension_semantics<parallel>, #tpu.dimension_semantics<arbitrary>], iteration_bounds = array<i64: 1, 1>, scalar_prefetch = 0 : i64, scratch_operands = 1 : i64, tpu.core_type = #tpu.core_type<tc>, window_params = [{transform_indices = @transform_0, window_bounds = array<i64: 8, 32>}, {transform_indices = @transform_1, window_bounds = array<i64: 8, 32>}, {transform_indices = @transform_2, window_bounds = array<i64: 8, 1>}]} {
    %c0_i32 = arith.constant 0 : i32
    %0 = arith.cmpi eq, %arg1, %c0_i32 : i32
    %1 = arith.extui %0 : i1 to i32
    %c0_i32_0 = arith.constant 0 : i32
    %2 = arith.cmpi ne, %1, %c0_i32_0 : i32
    scf.if %2 {
      %cst = arith.constant 0.000000e+00 : f32
      %13 = vector.broadcast %cst : f32 to vector<8x32xf32>
      %c0_10 = arith.constant 0 : index
      %c0_11 = arith.constant 0 : index
      %14 = vector.load %arg5[%c0_10, %c0_11] : memref<8x32xf32, #tpu.memory_space<vmem>>, vector<8x32xf32>
      tpu.vector_store %arg5[%c0_10, %c0_11], %13 {strides = array<i32>} : memref<8x32xf32, #tpu.memory_space<vmem>>, vector<8x32xf32>,
    } else {
    }
    %c0 = arith.constant 0 : index
    %c0_1 = arith.constant 0 : index
    %3 = vector.load %arg2[%c0, %c0_1] : memref<8x32xf32, #tpu.memory_space<vmem>>, vector<8x32xf32>
    %c0_2 = arith.constant 0 : index
    %c0_3 = arith.constant 0 : index
    %4 = vector.load %arg3[%c0_2, %c0_3] : memref<8x32xf32, #tpu.memory_space<vmem>>, vector<8x32xf32>
    %5 = arith.subf %3, %4 : vector<8x32xf32>
    %6 = arith.mulf %5, %5 : vector<8x32xf32>
    %c0_4 = arith.constant 0 : index
    %c0_5 = arith.constant 0 : index
    %7 = vector.load %arg5[%c0_4, %c0_5] : memref<8x32xf32, #tpu.memory_space<vmem>>, vector<8x32xf32>
    %8 = arith.addf %7, %6 : vector<8x32xf32>
    %c0_6 = arith.constant 0 : index
    %c0_7 = arith.constant 0 : index
    %9 = vector.load %arg5[%c0_6, %c0_7] : memref<8x32xf32, #tpu.memory_space<vmem>>, vector<8x32xf32>
    tpu.vector_store %arg5[%c0_6, %c0_7], %8 {strides = array<i32>} : memref<8x32xf32, #tpu.memory_space<vmem>>, vector<8x32xf32>,
    %c0_i32_8 = arith.constant 0 : i32
    %10 = arith.cmpi eq, %arg1, %c0_i32_8 : i32
    %11 = arith.extui %10 : i1 to i32
    %c0_i32_9 = arith.constant 0 : i32
    %12 = arith.cmpi ne, %11, %c0_i32_9 : i32
    scf.if %12 {
      %c0_10 = arith.constant 0 : index
      %c0_11 = arith.constant 0 : index
      %13 = vector.load %arg5[%c0_10, %c0_11] : memref<8x32xf32, #tpu.memory_space<vmem>>, vector<8x32xf32>
      %cst = arith.constant dense<0.000000e+00> : vector<8xf32>
      %14 = vector.multi_reduction <add>, %13, %cst [1] : vector<8x32xf32> to vector<8xf32>
      %15 = vector.shape_cast %14 : vector<8xf32> to vector<8x1xf32>
      %c0_12 = arith.constant 0 : index
      %c0_13 = arith.constant 0 : index
      %16 = vector.load %arg4[%c0_12, %c0_13] : memref<8x1xf32, #tpu.memory_space<vmem>>, vector<8x1xf32>
      tpu.vector_store %arg4[%c0_12, %c0_13], %15 {strides = array<i32>} : memref<8x1xf32, #tpu.memory_space<vmem>>, vector<8x1xf32>,
    } else {
    }
    return
  }
  func.func @transform_0(%arg0: i32, %arg1: i32) -> (i32, i32) {
    %c0_i32 = arith.constant 0 : i32
    return %arg0, %arg1 : i32, i32
  }
  func.func @transform_1(%arg0: i32, %arg1: i32) -> (i32, i32) {
    %c0_i32 = arith.constant 0 : i32
    return %arg0, %arg1 : i32, i32
  }
  func.func @transform_2(%arg0: i32, %arg1: i32) -> (i32, i32) {
    %c0_i32 = arith.constant 0 : i32
    %c0_i32_0 = arith.constant 0 : i32
    return %arg0, %c0_i32 : i32, i32
  }
}

</mosaic_0001>

<bundles_post_ra>
// kernel: tpu_custom_call.1
= control target key start
LH: loop header
LB: loop body
LE: loop exit
PB: predicated region body
PF: predicated region fallthrough
CT: control target
= control target key end

     0   :  { %7 = vsyncpa [#allocation4], 0  ;;  %s138_s0 = inlined_call_operand.hbm [shape: f32[8,32], index: 0, kind: input, shape index: {}]   ;;  %s139_s1 = inlined_call_operand.hbm [shape: f32[8,32], index: 1, kind: input, shape index: {}]   ;;  %s140_s2 = inlined_call_operand.vmem [shape: f32[8,1], index: 2, kind: output, shape index: {}]  }
   0x1   :  { %8 = vsyncpa [#allocation6], 0  ;;  %s111_s9 = smov [#allocation3]   ;;  %s112_s11 = smov [#allocation5]  }
   0x2   :  { %s15_s10 = sshll.u32 %s111_s9, 4  ;;  %s25_s12 = sshll.u32 %s112_s11, 4  ;;  %s16_s10 = int_to_ptr.vmem [resolvable:$true] %s15_s10  ;;  %s26_s12 = int_to_ptr.vmem [resolvable:$true] %s25_s12 }
   0x3   :  { %s75_s13 = scalar_lea.vmem %s16_s10, 128  ;;  %p80_p1 = scmp.lt.s32.totalorder %s16_s10, %s16_s10 }
   0x4   :  { %p76_p0 = scmp.ne.s32.totalorder %s16_s10, %s75_s13  ;;  %p81_p2 = scmp.lt.s32.totalorder %s75_s13, %s75_s13 }
   0x6   :  { %p82_p3 = por %p81_p2, %p80_p1 }
   0x8   :  { %p83_p4 = pnand %p82_p3, %p76_p0 }
   0xa   :  { %86 = shalt.err (!%p83_p4)
}
   0xb   :  { %18 = dma.hbm_to_vmem [thread:$0]  %s138_s0, 128, %s16_s10, [#allocation4]  }
   0xc   :  { %s95_s16 = scalar_lea.vmem %s26_s12, 128  ;;  %p100_p6 = scmp.lt.s32.totalorder %s26_s12, %s26_s12 }
   0xd   :  { %p96_p5 = scmp.ne.s32.totalorder %s26_s12, %s95_s16  ;;  %p101_p7 = scmp.lt.s32.totalorder %s95_s16, %s95_s16 }
   0xf   :  { %p102_p8 = por %p101_p7, %p100_p6 }
  0x11   :  { %p103_p9 = pnand %p102_p8, %p96_p5 }
  0x13   :  { %106 = shalt.err (!%p103_p9)
}
  0x14   :  { %28 = dma.hbm_to_vmem [thread:$0]  %s139_s1, 128, %s26_s12, [#allocation6]  }
  0x15   :  { %107 = dma.done.wait [#allocation4], 128  }
  0x16   :  { %108 = vsyncadd [#allocation4], 4294967168 }
  0x17   :  { %109 = dma.done.wait [#allocation6], 128  }
  0x18   :  { %110 = vsyncadd [#allocation6], 4294967168  ;;  %vm39_vm0 = vcmask 261120   ;;  %v113_v0 = vmov 0.0   ;;  %v41_v1 = vld [vmem:[#allocation3] sm:$0xff]  ;;  %v42_v2 = vld [vmem:[#allocation5] sm:$0xff] }
  0x19   :  { %40 = vst.msk [vmem:[#allocation2] sm:$0xff] %vm39_vm0, %v113_v0  ;;  %v43_v3 = vsub.f32 %v41_v1, %v42_v2  ;;  %vm56_vm1 = vcmask 7168  }
  0x1b   :  { %v44_v5 = vmul.f32 %v43_v3, %v43_v3 }
  0x20   :  { %v45_v4 = vld [vmem:[#allocation2] sm:$0xff] }
  0x21   :  { %v46_v6 = vadd.f32 %v45_v4, %v44_v5 }
  0x23   :  { %48 = vst.msk [vmem:[#allocation2] sm:$0xff] %vm39_vm0, %v46_v6 }
  0x2a   :  { %v52_v7 = vld [vmem:[#allocation2] sm:$0xff] }
  0x2b   :  { %v53_v8 = vsel %vm39_vm0, %v52_v7, 0.0 }
  0x2c   :  { %54 = vadd.xlane.f32.xlu0 %v53_v8 }
  0xb5   :  { %v55_v9 = vpop.xlane.xlu0 %54 }
  0xb6   :  { %57 = vst.msk [vmem:[%s140_s2] sm:$0xff] %vm56_vm1, %v55_v9 }
  0xb7   :  { %62 = vsyncpa [#allocation4], 1 }
  0xb8   :  { %63 = vsyncpa [#allocation6], 1 }

</bundles_post_ra>
